<compile_context>
chip_gen: v7x
topology: tpu7x:2x2x1
jax: 0.10.0
libtpu: 0.0.40
codegen_flags: <defaults>
</compile_context>

<pallas_src>
import jax
import jax.numpy as jnp
from jax.experimental import pallas as pl
from jax.experimental.pallas import tpu as pltpu


def _round_up(x, m):
    return ((x + m - 1) // m) * m


def mlp_kernel(x_ref,
               w1_ref, b1_ref,
               w2_ref, b2_ref,
               w3_ref, b3_ref,
               w4_ref, b4_ref,
               o_ref):
    # One batch tile per grid step. All four layers fused: 4 MXU matmuls
    # (bf16 in, f32 accumulate) + VPU bias/ReLU in f32, bf16 lane-dense store.
    bf16 = jnp.bfloat16

    h = x_ref[...].astype(bf16)                                   # one cast per tile
    h = jnp.dot(h, w1_ref[...], preferred_element_type=jnp.float32) + b1_ref[...]
    h = jnp.maximum(h, 0.0)

    h = jnp.dot(h.astype(bf16), w2_ref[...], preferred_element_type=jnp.float32) + b2_ref[...]
    h = jnp.maximum(h, 0.0)

    h = jnp.dot(h.astype(bf16), w3_ref[...], preferred_element_type=jnp.float32) + b3_ref[...]
    h = jnp.maximum(h, 0.0)

    h = jnp.dot(h.astype(bf16), w4_ref[...], preferred_element_type=jnp.float32) + b4_ref[...]
    o_ref[...] = h.astype(o_ref.dtype)     # bf16 store: halves output HBM traffic


def _pick_batch_tile(B):
    """Batch tile: >=2 grid steps once B >= 16 (v7x megacore), capped at 2048."""
    if B < 16:
        return B                              # grid=(1,), full-dim block
    return min(2048, _round_up(pl.cdiv(B, 2), 8))


def best_model_forward(x, params, num_classes):
    """x: [B, num_features] float32. params: dict from init_params (w4/b4 pre-padded)."""
    B, F = x.shape
    C = num_classes
    C_pad = _round_up(C, 128)                 # lane-dense padded output width

    w4p = params["w4"]                        # (64, C_pad), pre-padded in init_params
    b4p = params["b4"]                        # (1,  C_pad)
    assert w4p.shape[1] == C_pad and b4p.shape[1] == C_pad

    TB = _pick_batch_tile(B)
    grid = (pl.cdiv(B, TB),)

    # Streamed (batch-tiled) operands.
    x_spec = pl.BlockSpec((TB, F), lambda i: (i, 0))
    o_spec = pl.BlockSpec((TB, C_pad), lambda i: (i, 0))
    # Weights/biases: full-array blocks, constant index_map -> VMEM-resident.
    const = lambda a: pl.BlockSpec(a.shape, lambda i: (0, 0))

    weight_args = (params["w1"], params["b1"],
                   params["w2"], params["b2"],
                   params["w3"], params["b3"],
                   w4p, b4p)

    # Advisory cost hint for XLA's scheduler (bf16 weights + bf16 output).
    flops = 2 * B * (F * 256 + 256 * 128 + 128 * 64 + 64 * C_pad)
    bytes_accessed = (4 * B * F                       # x read (f32)
                      + 2 * B * C_pad                 # out write (bf16)
                      + 2 * (F * 256 + 256 * 128 + 128 * 64 + 64 * C_pad)
                      + 4 * (256 + 128 + 64 + C_pad))
    cost = pl.CostEstimate(flops=flops, transcendentals=0,
                           bytes_accessed=bytes_accessed)

    out_padded = pl.pallas_call(
        mlp_kernel,
        out_shape=jax.ShapeDtypeStruct((B, C_pad), jnp.bfloat16),
        grid_spec=pltpu.PrefetchScalarGridSpec(
            num_scalar_prefetch=0,
            grid=grid,
            in_specs=[x_spec] + [const(a) for a in weight_args],
            out_specs=o_spec,
        ),
        compiler_params=pltpu.CompilerParams(
            dimension_semantics=("parallel",),        # megacore sharding on v7x
            vmem_limit_bytes=32 * 1024 * 1024,        # headroom for large tiles
        ),
        cost_estimate=cost,
    )(x, *weight_args)

    return out_padded[:, :C].astype(jnp.float32)


def init_params(key, num_features, num_classes):
    """Deterministic synthetic init (uniform, roughly nn.Linear scale).

    Weights stored as [in, out] in bf16 (transpose of torch's [out, in]);
    biases stored as (1, out) in f32.  fc4's weight/bias are zero-padded once
    here to the lane-dense width (multiple of 128) so the forward path does
    no per-call padding.
    """
    dims = [num_features, 256, 128, 64, num_classes]
    params = {}
    for i in range(4):
        key, kw, kb = jax.random.split(key, 3)
        fan_in = dims[i]
        bound = 1.0 / float(fan_in) ** 0.5
        params[f"w{i+1}"] = jax.random.uniform(
            kw, (dims[i], dims[i + 1]), jnp.float32, -bound, bound
        ).astype(jnp.bfloat16)
        params[f"b{i+1}"] = jax.random.uniform(
            kb, (1, dims[i + 1]), jnp.float32, -bound, bound)

    # Pre-pad fc4 to lane-dense width (extra columns are exact zeros).
    C_pad = _round_up(num_classes, 128)
    params["w4"] = jnp.pad(params["w4"], ((0, 0), (0, C_pad - num_classes)))
    params["b4"] = jnp.pad(params["b4"], ((0, 0), (0, C_pad - num_classes)))
    return params


def reference_forward(x, params, num_classes):
    """Pure-JAX reference mirroring the kernel's bf16-in / f32-acc math (f32 out)."""
    bf16 = jnp.bfloat16
    h = jnp.dot(x.astype(bf16), params["w1"],
                preferred_element_type=jnp.float32) + params["b1"]
    h = jnp.maximum(h, 0.0)
    h = jnp.dot(h.astype(bf16), params["w2"],
                preferred_element_type=jnp.float32) + params["b2"]
    h = jnp.maximum(h, 0.0)
    h = jnp.dot(h.astype(bf16), params["w3"],
                preferred_element_type=jnp.float32) + params["b3"]
    h = jnp.maximum(h, 0.0)
    out = jnp.dot(h.astype(bf16), params["w4"],
                  preferred_element_type=jnp.float32) + params["b4"]
    return out[:, :num_classes]


if __name__ == "__main__":
    num_features = 32
    num_classes = 10

    key = jax.random.PRNGKey(0)
    key, kp = jax.random.split(key)
    params = init_params(kp, num_features, num_classes)

    # Case 1: tiny batch (grid=(1,), full-dim block path).
    key, kx = jax.random.split(key)
    x_small = jax.random.normal(kx, (8, num_features), jnp.float32)
    out_small = jax.block_until_ready(
        best_model_forward(x_small, params, num_classes))
    ref_small = reference_forward(x_small, params, num_classes)
    assert out_small.shape == (8, num_classes)
    assert jnp.allclose(out_small, ref_small, atol=3e-2, rtol=3e-2), \
        "mismatch vs reference (small batch)"

    # Case 2: larger batch exercising the multi-tile (>=2 grid step) path.
    key, kx2 = jax.random.split(key)
    x_big = jax.random.normal(kx2, (64, num_features), jnp.float32)
    out_big = jax.block_until_ready(
        best_model_forward(x_big, params, num_classes))
    ref_big = reference_forward(x_big, params, num_classes)
    assert out_big.shape == (64, num_classes)
    assert jnp.allclose(out_big, ref_big, atol=3e-2, rtol=3e-2), \
        "mismatch vs reference (multi-tile batch)"

    print("KERNEL_OK")
</pallas_src>

<mosaic_0001>
module attributes {stable_mosaic.version = 11 : i64} {
  func.func @mlp_kernel(%arg0: i32, %arg1: memref<8x32xf32, #tpu.memory_space<vmem>>, %arg2: memref<32x256xbf16, #tpu.memory_space<vmem>>, %arg3: memref<1x256xf32, #tpu.memory_space<vmem>>, %arg4: memref<256x128xbf16, #tpu.memory_space<vmem>>, %arg5: memref<1x128xf32, #tpu.memory_space<vmem>>, %arg6: memref<128x64xbf16, #tpu.memory_space<vmem>>, %arg7: memref<1x64xf32, #tpu.memory_space<vmem>>, %arg8: memref<64x128xbf16, #tpu.memory_space<vmem>>, %arg9: memref<1x128xf32, #tpu.memory_space<vmem>>, %arg10: memref<8x128xbf16, #tpu.memory_space<vmem>>) attributes {dimension_semantics = [#tpu.dimension_semantics<parallel>], iteration_bounds = array<i64: 1>, scalar_prefetch = 0 : i64, scratch_operands = 0 : i64, tpu.core_type = #tpu.core_type<tc>, window_params = [{transform_indices = @transform_0, window_bounds = array<i64: 8, 32>}, {pipeline_mode = #tpu.pipeline_mode<synchronous>, transform_indices = @transform_1, window_bounds = array<i64: 32, 256>}, {pipeline_mode = #tpu.pipeline_mode<synchronous>, transform_indices = @transform_2, window_bounds = array<i64: 1, 256>}, {pipeline_mode = #tpu.pipeline_mode<synchronous>, transform_indices = @transform_3, window_bounds = array<i64: 256, 128>}, {pipeline_mode = #tpu.pipeline_mode<synchronous>, transform_indices = @transform_4, window_bounds = array<i64: 1, 128>}, {pipeline_mode = #tpu.pipeline_mode<synchronous>, transform_indices = @transform_5, window_bounds = array<i64: 128, 64>}, {pipeline_mode = #tpu.pipeline_mode<synchronous>, transform_indices = @transform_6, window_bounds = array<i64: 1, 64>}, {pipeline_mode = #tpu.pipeline_mode<synchronous>, transform_indices = @transform_7, window_bounds = array<i64: 64, 128>}, {pipeline_mode = #tpu.pipeline_mode<synchronous>, transform_indices = @transform_8, window_bounds = array<i64: 1, 128>}, {transform_indices = @transform_9, window_bounds = array<i64: 8, 128>}]} {
    %c0 = arith.constant 0 : index
    %c0_0 = arith.constant 0 : index
    %0 = vector.load %arg1[%c0, %c0_0] : memref<8x32xf32, #tpu.memory_space<vmem>>, vector<8x32xf32>
    %1 = arith.truncf %0 : vector<8x32xf32> to vector<8x32xbf16>
    %c0_1 = arith.constant 0 : index
    %c0_2 = arith.constant 0 : index
    %2 = vector.load %arg2[%c0_1, %c0_2] : memref<32x256xbf16, #tpu.memory_space<vmem>>, vector<32x256xbf16>
    %cst = arith.constant dense<0.000000e+00> : vector<8x256xf32>
    %3 = tpu.matmul %1, %2, %cst {dimension_numbers = #tpu.dot_dimension_numbers<[1], [0], [0], [1], [0, 0, 1, 1], [], []>} : vector<8x32xbf16>, vector<32x256xbf16>, vector<8x256xf32> -> vector<8x256xf32>
    %c0_3 = arith.constant 0 : index
    %c0_4 = arith.constant 0 : index
    %4 = vector.load %arg3[%c0_3, %c0_4] : memref<1x256xf32, #tpu.memory_space<vmem>>, vector<1x256xf32>
    %5 = vector.broadcast %4 : vector<1x256xf32> to vector<8x256xf32>
    %6 = arith.addf %3, %5 : vector<8x256xf32>
    %cst_5 = arith.constant 0.000000e+00 : f32
    %7 = vector.broadcast %cst_5 : f32 to vector<8x256xf32>
    %8 = arith.maximumf %6, %7 : vector<8x256xf32>
    %9 = arith.truncf %8 : vector<8x256xf32> to vector<8x256xbf16>
    %c0_6 = arith.constant 0 : index
    %c0_7 = arith.constant 0 : index
    %10 = vector.load %arg4[%c0_6, %c0_7] : memref<256x128xbf16, #tpu.memory_space<vmem>>, vector<256x128xbf16>
    %cst_8 = arith.constant dense<0.000000e+00> : vector<8x128xf32>
    %11 = tpu.matmul %9, %10, %cst_8 {dimension_numbers = #tpu.dot_dimension_numbers<[1], [0], [0], [1], [0, 0, 1, 1], [], []>} : vector<8x256xbf16>, vector<256x128xbf16>, vector<8x128xf32> -> vector<8x128xf32>
    %c0_9 = arith.constant 0 : index
    %c0_10 = arith.constant 0 : index
    %12 = vector.load %arg5[%c0_9, %c0_10] : memref<1x128xf32, #tpu.memory_space<vmem>>, vector<1x128xf32>
    %13 = vector.broadcast %12 : vector<1x128xf32> to vector<8x128xf32>
    %14 = arith.addf %11, %13 : vector<8x128xf32>
    %cst_11 = arith.constant 0.000000e+00 : f32
    %15 = vector.broadcast %cst_11 : f32 to vector<8x128xf32>
    %16 = arith.maximumf %14, %15 : vector<8x128xf32>
    %17 = arith.truncf %16 : vector<8x128xf32> to vector<8x128xbf16>
    %c0_12 = arith.constant 0 : index
    %c0_13 = arith.constant 0 : index
    %18 = vector.load %arg6[%c0_12, %c0_13] : memref<128x64xbf16, #tpu.memory_space<vmem>>, vector<128x64xbf16>
    %cst_14 = arith.constant dense<0.000000e+00> : vector<8x64xf32>
    %19 = tpu.matmul %17, %18, %cst_14 {dimension_numbers = #tpu.dot_dimension_numbers<[1], [0], [0], [1], [0, 0, 1, 1], [], []>} : vector<8x128xbf16>, vector<128x64xbf16>, vector<8x64xf32> -> vector<8x64xf32>
    %c0_15 = arith.constant 0 : index
    %c0_16 = arith.constant 0 : index
    %20 = vector.load %arg7[%c0_15, %c0_16] : memref<1x64xf32, #tpu.memory_space<vmem>>, vector<1x64xf32>
    %21 = vector.broadcast %20 : vector<1x64xf32> to vector<8x64xf32>
    %22 = arith.addf %19, %21 : vector<8x64xf32>
    %cst_17 = arith.constant 0.000000e+00 : f32
    %23 = vector.broadcast %cst_17 : f32 to vector<8x64xf32>
    %24 = arith.maximumf %22, %23 : vector<8x64xf32>
    %25 = arith.truncf %24 : vector<8x64xf32> to vector<8x64xbf16>
    %c0_18 = arith.constant 0 : index
    %c0_19 = arith.constant 0 : index
    %26 = vector.load %arg8[%c0_18, %c0_19] : memref<64x128xbf16, #tpu.memory_space<vmem>>, vector<64x128xbf16>
    %cst_20 = arith.constant dense<0.000000e+00> : vector<8x128xf32>
    %27 = tpu.matmul %25, %26, %cst_20 {dimension_numbers = #tpu.dot_dimension_numbers<[1], [0], [0], [1], [0, 0, 1, 1], [], []>} : vector<8x64xbf16>, vector<64x128xbf16>, vector<8x128xf32> -> vector<8x128xf32>
    %c0_21 = arith.constant 0 : index
    %c0_22 = arith.constant 0 : index
    %28 = vector.load %arg9[%c0_21, %c0_22] : memref<1x128xf32, #tpu.memory_space<vmem>>, vector<1x128xf32>
    %29 = vector.broadcast %28 : vector<1x128xf32> to vector<8x128xf32>
    %30 = arith.addf %27, %29 : vector<8x128xf32>
    %31 = arith.truncf %30 : vector<8x128xf32> to vector<8x128xbf16>
    %c0_23 = arith.constant 0 : index
    %c0_24 = arith.constant 0 : index
    %32 = vector.load %arg10[%c0_23, %c0_24] : memref<8x128xbf16, #tpu.memory_space<vmem>>, vector<8x128xbf16>
    tpu.vector_store %arg10[%c0_23, %c0_24], %31 {strides = array<i32>} : memref<8x128xbf16, #tpu.memory_space<vmem>>, vector<8x128xbf16>,
    return
  }
  func.func @transform_0(%arg0: i32) -> (i32, i32) {
    %c0_i32 = arith.constant 0 : i32
    %c0_i32_0 = arith.constant 0 : i32
    return %arg0, %c0_i32 : i32, i32
  }
  func.func @transform_1(%arg0: i32) -> (i32, i32) {
    %c0_i32 = arith.constant 0 : i32
    %c0_i32_0 = arith.constant 0 : i32
    %c0_i32_1 = arith.constant 0 : i32
    return %c0_i32, %c0_i32_0 : i32, i32
  }
  func.func @transform_2(%arg0: i32) -> (i32, i32) {
    %c0_i32 = arith.constant 0 : i32
    %c0_i32_0 = arith.constant 0 : i32
    %c0_i32_1 = arith.constant 0 : i32
    return %c0_i32, %c0_i32_0 : i32, i32
  }
  func.func @transform_3(%arg0: i32) -> (i32, i32) {
    %c0_i32 = arith.constant 0 : i32
    %c0_i32_0 = arith.constant 0 : i32
    %c0_i32_1 = arith.constant 0 : i32
    return %c0_i32, %c0_i32_0 : i32, i32
  }
  func.func @transform_4(%arg0: i32) -> (i32, i32) {
    %c0_i32 = arith.constant 0 : i32
    %c0_i32_0 = arith.constant 0 : i32
    %c0_i32_1 = arith.constant 0 : i32
    return %c0_i32, %c0_i32_0 : i32, i32
  }
  func.func @transform_5(%arg0: i32) -> (i32, i32) {
    %c0_i32 = arith.constant 0 : i32
    %c0_i32_0 = arith.constant 0 : i32
    %c0_i32_1 = arith.constant 0 : i32
    return %c0_i32, %c0_i32_0 : i32, i32
  }
  func.func @transform_6(%arg0: i32) -> (i32, i32) {
    %c0_i32 = arith.constant 0 : i32
    %c0_i32_0 = arith.constant 0 : i32
    %c0_i32_1 = arith.constant 0 : i32
    return %c0_i32, %c0_i32_0 : i32, i32
  }
  func.func @transform_7(%arg0: i32) -> (i32, i32) {
    %c0_i32 = arith.constant 0 : i32
    %c0_i32_0 = arith.constant 0 : i32
    %c0_i32_1 = arith.constant 0 : i32
    return %c0_i32, %c0_i32_0 : i32, i32
  }
  func.func @transform_8(%arg0: i32) -> (i32, i32) {
    %c0_i32 = arith.constant 0 : i32
    %c0_i32_0 = arith.constant 0 : i32
    %c0_i32_1 = arith.constant 0 : i32
    return %c0_i32, %c0_i32_0 : i32, i32
  }
  func.func @transform_9(%arg0: i32) -> (i32, i32) {
    %c0_i32 = arith.constant 0 : i32
    %c0_i32_0 = arith.constant 0 : i32
    return %arg0, %c0_i32 : i32, i32
  }
}

</mosaic_0001>

<bundles_post_ra>
// kernel: tpu_custom_call.1
= control target key start
LH: loop header
LB: loop body
LE: loop exit
PB: predicated region body
PF: predicated region fallthrough
CT: control target
= control target key end

     0   :  { %14 = vsyncpa [#allocation3], 0  ;;  %s877_s0 = inlined_call_operand.vmem [shape: f32[8,32], index: 0, kind: input, shape index: {}]   ;;  %s878_s1 = inlined_call_operand.vmem [shape: bf16[32,256], index: 1, kind: input, shape index: {}]   ;;  %s879_s2 = inlined_call_operand.vmem [shape: f32[1,256], index: 2, kind: input, shape index: {}]   ;;  %s880_s3 = inlined_call_operand.hbm [shape: bf16[256,128], index: 3, kind: input, shape index: {}]   ;;  %s881_s4 = inlined_call_operand.vmem [shape: f32[1,128], index: 4, kind: input, shape index: {}]   ;;  %s882_s5 = inlined_call_operand.vmem [shape: bf16[128,64], index: 5, kind: input, shape index: {}]   ;;  %s883_s6 = inlined_call_operand.vmem [shape: f32[1,64], index: 6, kind: input, shape index: {}]   ;;  %s884_s7 = inlined_call_operand.vmem [shape: bf16[64,128], index: 7, kind: input, shape index: {}]   ;;  %s885_s8 = inlined_call_operand.vmem [shape: f32[1,128], index: 8, kind: input, shape index: {}]   ;;  %s886_s9 = inlined_call_operand.hbm [shape: bf16[8,128], index: 9, kind: output, shape index: {}]  }
   0x1   :  { %15 = vsyncpa [#allocation4], 0  ;;  %s719_s30 = smov [#allocation2]   ;;  %s671_s13 = scalar_lea.hbm %s880_s3, 2048 }
   0x2   :  { %s27_s10 = sshll.u32 %s719_s30, 4  ;;  %p672_p0 = scmp.ne.s32.totalorder %s880_s3, %s671_s13  ;;  %s28_s10 = int_to_ptr.vmem [resolvable:$true] %s27_s10 }
   0x3   :  { %p675_p1 = scmp.lt.u32.totalorder %s671_s13, %s880_s3 }
   0x5   :  { %p677_p2 = pnand %p675_p1, %p672_p0 }
   0x7   :  { %680 = shalt.err (!%p677_p2)
}
   0x8   :  { %s681_s18 = scalar_lea.vmem %s28_s10, 2048  ;;  %p686_p4 = scmp.lt.s32.totalorder %s28_s10, %s28_s10 }
   0x9   :  { %p682_p3 = scmp.ne.s32.totalorder %s28_s10, %s681_s18  ;;  %p687_p5 = scmp.lt.s32.totalorder %s681_s18, %s681_s18 }
   0xb   :  { %p688_p6 = por %p687_p5, %p686_p4 }
   0xd   :  { %p689_p7 = pnand %p688_p6, %p682_p3 }
   0xf   :  { %692 = shalt.err (!%p689_p7)
}
  0x10   :  { %s720_s19 = smov 64   ;;  %s721_s20 = smov 4  }
  0x11   :  { %33 = dma.hbm_to_vmem [thread:$0]  %s880_s3, 2048, %s28_s10, [#allocation3], %s720_s19, %s720_s19, %s721_s20  }
  0x12   :  { %715 = dma.done.wait [#allocation3], 2048  }
  0x13   :  { %716 = vsyncadd [#allocation3], 4294965248  ;;  %v722_v0 = vmov 0   ;;  %v637_v1 = vld [vmem:[%s878_s1 + $0x4] ss:$8 sps:$4 sm:$0xff]   ;;  %vm86_vm0 = vcmask 261120   ;;  %v56_v30 = vlaneseq }
  0x14   :  { %122 = vmatprep.mubr.bf16.mxu0 %v722_v0  ;;  %v639_v2 = vld [vmem:[%s878_s1] ss:$8 sps:$4 sm:$0xff]   ;;  %90 = vmatprep.subr.bf16.mxu0 %v637_v1  ;;  %v640_v3 = vld [vmem:[%s878_s1 + $0x14] ss:$8 sps:$4 sm:$0xff]   ;;  %v642_v4 = vld [vmem:[%s878_s1 + $0x10] ss:$8 sps:$4 sm:$0xff]  }
  0x15   :  { %v48_v5 = vld [vmem:[%s877_s0] sm:$0xff]  ;;  %91 = vmatpush1.bf16.msra.mxu0 %v639_v2  ;;  %v645_v8 = vld [vmem:[#allocation2 + $0x48] sm:$0xff]   ;;  %v647_v11 = vld [vmem:[#allocation2 + $0x50] sm:$0xff]   ;;  %v723_v24 = vmov 0.0   ;;  %v57_v31 = vshrl.u32 %v56_v30, 7  ;;  %vm724_vm1 = vmmov 0  }
  0x16   :  { %v643_v6 = vld [vmem:[#allocation2 + $0x40] sm:$0xff]   ;;  %92 = vmatprep.subr.bf16.mxu0 %v640_v3  ;;  %v49_v9 = vpack.c.bf16 %v48_v5, %v48_v5  ;;  %v646_v10 = vld [vmem:[#allocation2 + $0x8] sm:$0xff]   ;;  %v648_v12 = vld [vmem:[#allocation2 + $0x10] sm:$0xff]   ;;  %vm464_vm2 = vcmask 523264  }
  0x17   :  { %v644_v7 = vld [vmem:[#allocation2] sm:$0xff]   ;;  %562 = vmatprep.subr.bf16.mxu1 %v643_v6  ;;  %v649_v13 = vld [vmem:[#allocation2 + $0x58] sm:$0xff]   ;;  %v653_v17 = vld [vmem:[#allocation2 + $0x68] sm:$0xff]   ;;  %v58_v32 = vsub.s32 0, %v57_v31  ;;  %v62_v34 = vsub.s32 1, %v57_v31 }
  0x18   :  { %563 = vmatpush3.bf16.msra.mxu1 %v644_v7  ;;  %v650_v14 = vld [vmem:[#allocation2 + $0x18] sm:$0xff]   ;;  %v651_v15 = vld [vmem:[#allocation2 + $0x60] sm:$0xff]   ;;  %v654_v18 = vld [vmem:[#allocation2 + $0x28] sm:$0xff]  }
  0x19   :  { %93 = vmatpush1.bf16.msra.mxu0 %v642_v4  ;;  %564 = vmatprep.subr.bf16.mxu1 %v645_v8  ;;  %v652_v16 = vld [vmem:[#allocation2 + $0x20] sm:$0xff]   ;;  %v655_v19 = vld [vmem:[#allocation2 + $0x70] sm:$0xff]   ;;  %v657_v21 = vld [vmem:[#allocation2 + $0x78] sm:$0xff]  }
  0x1a   :  { %v656_v20 = vld [vmem:[#allocation2 + $0x30] sm:$0xff]   ;;  %v658_v22 = vld [vmem:[#allocation2 + $0x38] sm:$0xff]   ;;  %v659_v23 = vld [vmem:[%s882_s5] sm:$0xff]   ;;  %598 = vmatprep.subr.bf16.mxu0 %v723_v24 }
  0x1b   :  { %v660_v25 = vld [vmem:[%s882_s5 + $0x8] sm:$0xff]   ;;  %v661_v26 = vld [vmem:[%s882_s5 + $0x10] sm:$0xff]   ;;  %v662_v27 = vld [vmem:[%s882_s5 + $0x18] sm:$0xff]  }
  0x1c   :  { %529 = vmatmul.mubr.msk.bf16.vlgmr.msra.gmra.mrb[0].mxu0 %vm86_vm0, %v49_v9  ;;  %565 = vmatpush3.bf16.msra.mxu1 %v646_v10  ;;  %v663_v28 = vld [vmem:[%s882_s5 + $0x20] sm:$0xff]   ;;  %v664_v29 = vld [vmem:[%s882_s5 + $0x28] sm:$0xff]   ;;  %v665_v47 = vld [vmem:[%s882_s5 + $0x30] sm:$0xff]  }
  0x1d   :  { %566 = vmatprep.subr.bf16.mxu1 %v647_v11  ;;  %599 = vmatpush3.bf16.msra.mxu0 %v659_v23  ;;  %v54_v33 = vld [vmem:[%s879_s2] sm:$0x3]  ;;  %v666_v48 = vld [vmem:[%s882_s5 + $0x38] sm:$0xff]   ;;  %v668_v50 = vld [vmem:[%s884_s7 + $0x8] sm:$0xff]  }
  0x1e   :  { %600 = vmatprep.subr.bf16.mxu0 %v723_v24  ;;  %v59_v35 = vrot.slane %v54_v33, %v58_v32  ;;  %v63_v36 = vrot.slane %v54_v33, %v62_v34  ;;  %614 = vmatprep.mubr.msk.bf16.mxu0 %vm724_vm1, %v723_v24  ;;  %v667_v49 = vld [vmem:[%s884_s7] sm:$0xff]   ;;  %v669_v60 = vld [vmem:[%s884_s7 + $0x10] sm:$0xff]   ;;  %v670_v61 = vld [vmem:[%s884_s7 + $0x18] sm:$0xff]   ;;  %s725_s7 = smov [#allocation5]  }
  0x1f   :  { %v530_v52 = vld [vmem:[%s881_s4] ss:$0 sm:$0xff]  ;;  %s516_s14 = sshll.u32 %s725_s7, 4  ;;  %s517_s14 = int_to_ptr.vmem [resolvable:$true] %s516_s14 }
  0x20   :  { %567 = vmatpush3.bf16.msra.mxu1 %v648_v12  ;;  %v547_v62 = vld [vmem:[%s883_s6] ss:$0 sm:$0xff]  ;;  %s693_s6 = scalar_lea.vmem %s517_s14, 64  ;;  %p698_p9 = scmp.lt.s32.totalorder %s517_s14, %s517_s14 }
  0x21   :  { %568 = vmatprep.subr.bf16.mxu1 %v649_v13  ;;  %601 = vmatpush3.bf16.msra.mxu0 %v660_v25  ;;  %v556_v6 = vld [vmem:[%s885_s8] ss:$0 sm:$0xff]  ;;  %p694_p8 = scmp.ne.s32.totalorder %s517_s14, %s693_s6  ;;  %p699_p10 = scmp.lt.s32.totalorder %s693_s6, %s693_s6 }
  0x22   :  { %602 = vmatprep.subr.bf16.mxu0 %v723_v24 }
  0x23   :  { %p700_p11 = por %p699_p10, %p698_p9 }
  0x24   :  { %569 = vmatpush3.bf16.msra.mxu1 %v650_v14 }
  0x25   :  { %570 = vmatprep.subr.bf16.mxu1 %v651_v15  ;;  %603 = vmatpush3.bf16.msra.mxu0 %v661_v26  ;;  %p701_p12 = pnand %p700_p11, %p694_p8 }
  0x26   :  { %604 = vmatprep.subr.bf16.mxu0 %v723_v24 }
  0x28   :  { %571 = vmatpush3.bf16.msra.mxu1 %v652_v16 }
  0x29   :  { %572 = vmatprep.subr.bf16.mxu1 %v653_v17  ;;  %605 = vmatpush3.bf16.msra.mxu0 %v662_v27 }
  0x2a   :  { %606 = vmatprep.subr.bf16.mxu0 %v723_v24 }
  0x2c   :  { %573 = vmatpush3.bf16.msra.mxu1 %v654_v18 }
  0x2d   :  { %574 = vmatprep.subr.bf16.mxu1 %v655_v19  ;;  %607 = vmatpush3.bf16.msra.mxu0 %v663_v28 }
  0x2e   :  { %608 = vmatprep.subr.bf16.mxu0 %v723_v24 }
  0x30   :  { %575 = vmatpush3.bf16.msra.mxu1 %v656_v20 }
  0x31   :  { %576 = vmatprep.subr.bf16.mxu1 %v657_v21  ;;  %609 = vmatpush3.bf16.msra.mxu0 %v664_v29 }
  0x32   :  { %610 = vmatprep.subr.bf16.mxu0 %v723_v24 }
  0x34   :  { %577 = vmatpush3.bf16.msra.mxu1 %v658_v22 }
  0x35   :  { %618 = vmatprep.subr.bf16.mxu1 %v723_v24  ;;  %611 = vmatpush3.bf16.msra.mxu0 %v665_v47 }
  0x36   :  { %612 = vmatprep.subr.bf16.mxu0 %v723_v24 }
  0x39   :  { %613 = vmatpush3.bf16.msra.mxu0 %v666_v48 }
  0xef   :  { %v124_v37 = vpop.f32.mrb[0].mxu0 }
  0xf0   :  { %v125_v38 = vadd.f32 %v124_v37, %v59_v35  ;;  %v126_v39 = vpop.f32.mrb[1].mxu0 }
  0xf1   :  { %v127_v40 = vadd.f32 %v126_v39, %v63_v36  ;;  %v128_v41 = vpop.f32.mrb[2].mxu0 }
  0xf2   :  { %v131_v42 = vmax.f32 %v125_v38, 0.0  ;;  %v129_v43 = vpop.f32.mrb[3].mxu0 }
  0xf3   :  { %v132_v44 = vmax.f32 %v127_v40, 0.0 }
  0xf4   :  { %v133_v46 = vpack.c.bf16 %v131_v42, %v131_v42 }
  0xf5   :  { %v134_v45 = vpack.c.bf16 %v132_v44, %v132_v44 }
  0xf7   :  { %302 = vmatprep.mubr.bf16.mxu1 %v134_v45 }
  0xf8   :  { %303 = vmatmul.mubr.bf16.vlgmr.msra.gmra.mrb[0].mxu1 %v133_v46 }
  0xf9   :  { %626 = vmatprep.mubr.msk.bf16.mxu1 %vm724_vm1, %v723_v24  ;;  %619 = vmatpush3.bf16.msra.mxu1 %v667_v49 }
  0xfa   :  { %620 = vmatprep.subr.bf16.mxu1 %v723_v24 }
  0xfd   :  { %621 = vmatpush3.bf16.msra.mxu1 %v668_v50 }
  0xfe   :  { %622 = vmatprep.subr.bf16.mxu1 %v723_v24 }
 0x101   :  { %623 = vmatpush3.bf16.msra.mxu1 %v669_v60 }
 0x102   :  { %624 = vmatprep.subr.bf16.mxu1 %v723_v24 }
 0x105   :  { %625 = vmatpush3.bf16.msra.mxu1 %v670_v61 }
 0x1cb   :  { %v578_v51 = vpop.f32.mrb[0].mxu1 }
 0x1cc   :  { %v579_v53 = vpop.f32.mrb[1].mxu1 }
 0x1cd   :  { %v580_v54 = vadd.f32 %v579_v53, %v578_v51  ;;  %v581_v55 = vpop.f32.mrb[2].mxu1 }
 0x1ce   :  { %v582_v56 = vpop.f32.mrb[3].mxu1 }
 0x1cf   :  { %v305_v57 = vadd.f32 %v580_v54, %v530_v52 }
 0x1d1   :  { %v310_v58 = vmax.f32 %v305_v57, 0.0 }
 0x1d3   :  { %v311_v59 = vpack.c.bf16 %v310_v58, %v310_v58 }
 0x1d5   :  { %615 = vmatmul.mubr.bf16.vlgmr.msra.gmra.mrb[4].mxu0 %v311_v59 }
 0x2a8   :  { %v417_v63 = vpop.f32.mrb[4].mxu0 }
 0x2a9   :  { %v418_v0 = vadd.f32 %v547_v62, %v417_v63  ;;  %v616_v1 = vpop.f32.mrb[5].mxu0 }
 0x2aa   :  { %v420_v2 = vpop.f32.mrb[6].mxu0 }
 0x2ab   :  { %v423_v3 = vmax.f32 %v418_v0, 0.0  ;;  %v617_v4 = vpop.f32.mrb[7].mxu0 }
 0x2ad   :  { %v424_v5 = vpack.c.bf16 %v423_v3, %v423_v3 }
 0x2af   :  { %627 = vmatmul.mubr.msk.bf16.vlgmr.msra.gmra.mrb[4].mxu1 %vm464_vm2, %v424_v5 }
 0x382   :  { %v502_v7 = vpop.f32.mrb[4].mxu1 }
 0x383   :  { %v503_v8 = vadd.f32 %v556_v6, %v502_v7  ;;  %v628_v9 = vpop.f32.mrb[5].mxu1 }
 0x384   :  { %v505_v10 = vpop.f32.mrb[6].mxu1 }
 0x385   :  { %v508_v11 = vpack.c.bf16 %v503_v8, %v503_v8  ;;  %v629_v12 = vpop.f32.mrb[7].mxu1 }
 0x387   :  { %509 = vst [vmem:[#allocation5] sm:$0xf] %v508_v11 }
 0x388   :  { %704 = shalt.err (!%p701_p12)
}
 0x389   :  { %s705_s8 = scalar_lea.hbm %s886_s9, 64 }
 0x38a   :  { %p706_p13 = scmp.ne.s32.totalorder %s886_s9, %s705_s8  ;;  %p709_p0 = scmp.lt.u32.totalorder %s705_s8, %s886_s9 }
 0x38c   :  { %p711_p1 = pnand %p709_p0, %p706_p13 }
 0x38e   :  { %714 = shalt.err (!%p711_p1)
}
 0x38f   :  { %519 = dma.vmem_to_hbm [thread:$0]  %s517_s14, 64, %s886_s9, [#allocation4]  }
 0x390   :  { %717 = dma.done.wait [#allocation4], 64  }
 0x391   :  { %718 = vsyncadd [#allocation4], 4294967232 }
 0x392   :  { %523 = vsyncpa [#allocation3], 1 }
 0x393   :  { %524 = vsyncpa [#allocation4], 1 }

</bundles_post_ra>
